<compile_context>
chip_gen: v6e
topology: v6e:2x2x1
jax: 0.10.0
libtpu: 0.0.40
codegen_flags: <defaults>
</compile_context>

<pallas_src>
import numpy as np
import jax
import jax.numpy as jnp
from jax.experimental import pallas as pl
from jax.experimental.pallas import tpu as pltpu

OBS_FEATS = 13
HID1 = 8
HID2 = 8
LANE = 128
TB_MAX = 8192     # batch columns (lane axis) per grid step; multiple of 128


def _round_up(x, m):
    return (x + m - 1) // m * m


# ---------------------------------------------------------------------------
# Deterministic parameter init (mirrors layer_init: orthogonal(std=sqrt(2)),
# bias = 0).  Not bit-identical to torch.nn.init.orthogonal_; for parity
# tests against the PyTorch HLC, load torch-exported weights instead.
# Weights are stored torch-style (out_features, in_features).
# ---------------------------------------------------------------------------
def _orthogonal(rng, rows, cols, gain):
    n, m = max(rows, cols), min(rows, cols)
    a = rng.standard_normal((n, m))
    q, r = np.linalg.qr(a)
    q = q * np.sign(np.diag(r))      # deterministic / unique decomposition
    if rows < cols:
        q = q.T                      # (rows, cols) with orthonormal rows
    return (gain * q[:rows, :cols]).astype(np.float32)


def make_params(seed=0):
    rng = np.random.default_rng(seed)
    gain = np.sqrt(2.0)
    return {
        "w1": jnp.asarray(_orthogonal(rng, HID1, OBS_FEATS, gain)),  # (8, 13)
        "b1": jnp.zeros((HID1, 1), jnp.float32),                     # (8, 1)
        "w2": jnp.asarray(_orthogonal(rng, HID2, HID1, gain)),       # (8, 8)
        "b2": jnp.zeros((HID2, 1), jnp.float32),                     # (8, 1)
    }


# ---------------------------------------------------------------------------
# Pallas kernel:  relu(W1 @ x + b1)  ->  tanh(W2 @ . + b2)   (batch on lanes)
# ---------------------------------------------------------------------------
def hlc_kernel(x_ref, w1_ref, b1_ref, w2_ref, b2_ref, o_ref):
    x = x_ref[...].astype(jnp.float32)                                   # (13, tb)
    h1 = jnp.dot(w1_ref[...], x, preferred_element_type=jnp.float32)     # (8, tb) MXU
    h1 = jnp.maximum(h1 + b1_ref[...], 0.0)                              # relu (VPU)
    h2 = jnp.dot(w2_ref[...], h1, preferred_element_type=jnp.float32)    # (8, tb) MXU
    o_ref[...] = jnp.tanh(h2 + b2_ref[...]).astype(o_ref.dtype)          # tanh (EUP)


def _pick_tile(B):
    """Batch-tile (lane) width and grid steps.  Multi-step tiles are multiples
    of 128 and the step count is even so v7x's 2 TensorCores split evenly."""
    if B <= TB_MAX:
        return B, 1                                   # single full-extent block
    steps = -(-B // TB_MAX)
    if steps % 2:
        steps += 1                                    # even split for megacore
    tb = _round_up(-(-B // steps), LANE)
    steps = -(-B // tb)
    return tb, steps


def hlc_forward_t(obs_t, params):
    """Optimized lane-dense path.  obs_t: (13, B) feature-major. Returns (8, B) f32."""
    f, B = obs_t.shape
    assert f == OBS_FEATS, "obs_t must be a (13, B) feature-major slab"
    tb, steps = _pick_tile(B)

    # Double-buffered working set (+20-25% headroom) + weights; floor 8 MiB so
    # internal scratch always fits; well under v7x's 64 MiB physical VMEM.
    itemsize = jnp.dtype(obs_t.dtype).itemsize
    vmem_limit = int(1.25 * 2 * tb * (OBS_FEATS * itemsize + HID2 * 4)) + (2 << 20)
    vmem_limit = max(vmem_limit, 8 << 20)

    return pl.pallas_call(
        hlc_kernel,
        out_shape=jax.ShapeDtypeStruct((HID2, B), jnp.float32),
        grid_spec=pltpu.PrefetchScalarGridSpec(
            num_scalar_prefetch=0,
            grid=(steps,),
            in_specs=[
                pl.BlockSpec((OBS_FEATS, tb), lambda i: (0, i)),    # obs tile (lane-dense)
                pl.BlockSpec((HID1, OBS_FEATS), lambda i: (0, 0)),  # W1 resident
                pl.BlockSpec((HID1, 1), lambda i: (0, 0)),          # b1 resident
                pl.BlockSpec((HID2, HID1), lambda i: (0, 0)),       # W2 resident
                pl.BlockSpec((HID2, 1), lambda i: (0, 0)),          # b2 resident
            ],
            out_specs=pl.BlockSpec((HID2, tb), lambda i: (0, i)),
        ),
        compiler_params=pltpu.CompilerParams(
            dimension_semantics=("parallel",),        # shard batch axis over v7x's 2 TCs
            vmem_limit_bytes=vmem_limit,
        ),
    )(obs_t, params["w1"], params["b1"], params["w2"], params["b2"])


def hlc_forward(obs, params):
    """Torch-compatible API: obs (B, F) with F >= 13 -> (B, 8) float32.

    Layout plumbing only: slices the 13 used features and transposes so the
    kernel sees a feature-major slab (batch on the 128-lane axis).  Callers
    that already hold feature-major obs should use hlc_forward_t directly.
    """
    B, F = obs.shape
    assert F >= OBS_FEATS, "obs must have at least 13 features"
    obs_t = jnp.transpose(obs[:, :OBS_FEATS])         # (13, B)
    return jnp.transpose(hlc_forward_t(obs_t, params))  # (B, 8)


# ---------------------------------------------------------------------------
# Reference (plain JAX) for sanity checking.
# ---------------------------------------------------------------------------
def hlc_ref(obs, params):
    x = obs[:, :OBS_FEATS].astype(jnp.float32)
    h1 = jax.nn.relu(x @ params["w1"].T + params["b1"][:, 0])
    return jnp.tanh(h1 @ params["w2"].T + params["b2"][:, 0])


if __name__ == "__main__":
    params = make_params(seed=0)

    # Small deterministic test (single grid step).
    key = jax.random.PRNGKey(0)
    B, F = 8, 16                       # obs has >= 13 features
    obs = jax.random.normal(key, (B, F), dtype=jnp.float32)

    out = hlc_forward(obs, params)
    jax.block_until_ready(out)
    np.testing.assert_allclose(np.asarray(out), np.asarray(hlc_ref(obs, params)),
                               rtol=1e-5, atol=1e-5)
    assert out.shape == (B, HID2) and out.dtype == jnp.float32

    # Secondary check: multi-step grid with a ragged tail (exercises the
    # pipelined tiles, even megacore split and OOB-column masking).
    B2 = 2 * TB_MAX + 40
    obs2 = jax.random.normal(jax.random.PRNGKey(1), (B2, F), dtype=jnp.float32)
    out2 = hlc_forward(obs2, params)
    jax.block_until_ready(out2)
    np.testing.assert_allclose(np.asarray(out2), np.asarray(hlc_ref(obs2, params)),
                               rtol=1e-5, atol=1e-5)
    assert out2.shape == (B2, HID2)

    print("KERNEL_OK")
</pallas_src>

<mosaic_0001>
module attributes {stable_mosaic.version = 11 : i64} {
  func.func @hlc_kernel(%arg0: i32, %arg1: memref<13x8xf32, #tpu.memory_space<vmem>>, %arg2: memref<8x13xf32, #tpu.memory_space<vmem>>, %arg3: memref<8x1xf32, #tpu.memory_space<vmem>>, %arg4: memref<8x8xf32, #tpu.memory_space<vmem>>, %arg5: memref<8x1xf32, #tpu.memory_space<vmem>>, %arg6: memref<8x8xf32, #tpu.memory_space<vmem>>) attributes {dimension_semantics = [#tpu.dimension_semantics<parallel>], iteration_bounds = array<i64: 1>, scalar_prefetch = 0 : i64, scratch_operands = 0 : i64, tpu.core_type = #tpu.core_type<tc>, window_params = [{transform_indices = @transform_0, window_bounds = array<i64: 13, 8>}, {pipeline_mode = #tpu.pipeline_mode<synchronous>, transform_indices = @transform_1, window_bounds = array<i64: 8, 13>}, {pipeline_mode = #tpu.pipeline_mode<synchronous>, transform_indices = @transform_2, window_bounds = array<i64: 8, 1>}, {pipeline_mode = #tpu.pipeline_mode<synchronous>, transform_indices = @transform_3, window_bounds = array<i64: 8, 8>}, {pipeline_mode = #tpu.pipeline_mode<synchronous>, transform_indices = @transform_4, window_bounds = array<i64: 8, 1>}, {transform_indices = @transform_5, window_bounds = array<i64: 8, 8>}]} {
    %c0 = arith.constant 0 : index
    %c0_0 = arith.constant 0 : index
    %0 = vector.load %arg1[%c0, %c0_0] : memref<13x8xf32, #tpu.memory_space<vmem>>, vector<13x8xf32>
    %c0_1 = arith.constant 0 : index
    %c0_2 = arith.constant 0 : index
    %1 = vector.load %arg2[%c0_1, %c0_2] : memref<8x13xf32, #tpu.memory_space<vmem>>, vector<8x13xf32>
    %cst = arith.constant dense<0.000000e+00> : vector<8x8xf32>
    %2 = tpu.matmul %1, %0, %cst {dimension_numbers = #tpu.dot_dimension_numbers<[1], [0], [0], [1], [0, 0, 1, 1], [], []>} : vector<8x13xf32>, vector<13x8xf32>, vector<8x8xf32> -> vector<8x8xf32>
    %c0_3 = arith.constant 0 : index
    %c0_4 = arith.constant 0 : index
    %3 = vector.load %arg3[%c0_3, %c0_4] : memref<8x1xf32, #tpu.memory_space<vmem>>, vector<8x1xf32>
    %4 = vector.broadcast %3 : vector<8x1xf32> to vector<8x8xf32>
    %5 = arith.addf %2, %4 : vector<8x8xf32>
    %cst_5 = arith.constant 0.000000e+00 : f32
    %6 = vector.broadcast %cst_5 : f32 to vector<8x8xf32>
    %7 = arith.maximumf %5, %6 : vector<8x8xf32>
    %c0_6 = arith.constant 0 : index
    %c0_7 = arith.constant 0 : index
    %8 = vector.load %arg4[%c0_6, %c0_7] : memref<8x8xf32, #tpu.memory_space<vmem>>, vector<8x8xf32>
    %cst_8 = arith.constant dense<0.000000e+00> : vector<8x8xf32>
    %9 = tpu.matmul %8, %7, %cst_8 {dimension_numbers = #tpu.dot_dimension_numbers<[1], [0], [0], [1], [0, 0, 1, 1], [], []>} : vector<8x8xf32>, vector<8x8xf32>, vector<8x8xf32> -> vector<8x8xf32>
    %c0_9 = arith.constant 0 : index
    %c0_10 = arith.constant 0 : index
    %10 = vector.load %arg5[%c0_9, %c0_10] : memref<8x1xf32, #tpu.memory_space<vmem>>, vector<8x1xf32>
    %11 = vector.broadcast %10 : vector<8x1xf32> to vector<8x8xf32>
    %12 = arith.addf %9, %11 : vector<8x8xf32>
    %13 = math.tanh %12 : vector<8x8xf32>
    %c0_11 = arith.constant 0 : index
    %c0_12 = arith.constant 0 : index
    %14 = vector.load %arg6[%c0_11, %c0_12] : memref<8x8xf32, #tpu.memory_space<vmem>>, vector<8x8xf32>
    tpu.vector_store %arg6[%c0_11, %c0_12], %13 {strides = array<i32>} : memref<8x8xf32, #tpu.memory_space<vmem>>, vector<8x8xf32>,
    return
  }
  func.func @transform_0(%arg0: i32) -> (i32, i32) {
    %c0_i32 = arith.constant 0 : i32
    %c0_i32_0 = arith.constant 0 : i32
    return %c0_i32, %arg0 : i32, i32
  }
  func.func @transform_1(%arg0: i32) -> (i32, i32) {
    %c0_i32 = arith.constant 0 : i32
    %c0_i32_0 = arith.constant 0 : i32
    %c0_i32_1 = arith.constant 0 : i32
    return %c0_i32, %c0_i32_0 : i32, i32
  }
  func.func @transform_2(%arg0: i32) -> (i32, i32) {
    %c0_i32 = arith.constant 0 : i32
    %c0_i32_0 = arith.constant 0 : i32
    %c0_i32_1 = arith.constant 0 : i32
    return %c0_i32, %c0_i32_0 : i32, i32
  }
  func.func @transform_3(%arg0: i32) -> (i32, i32) {
    %c0_i32 = arith.constant 0 : i32
    %c0_i32_0 = arith.constant 0 : i32
    %c0_i32_1 = arith.constant 0 : i32
    return %c0_i32, %c0_i32_0 : i32, i32
  }
  func.func @transform_4(%arg0: i32) -> (i32, i32) {
    %c0_i32 = arith.constant 0 : i32
    %c0_i32_0 = arith.constant 0 : i32
    %c0_i32_1 = arith.constant 0 : i32
    return %c0_i32, %c0_i32_0 : i32, i32
  }
  func.func @transform_5(%arg0: i32) -> (i32, i32) {
    %c0_i32 = arith.constant 0 : i32
    %c0_i32_0 = arith.constant 0 : i32
    return %c0_i32, %arg0 : i32, i32
  }
}

</mosaic_0001>

<bundles_post_ra>
// kernel: tpu_custom_call.1
= control target key start
LH: loop header
LB: loop body
LE: loop exit
PB: predicated region body
PF: predicated region fallthrough
CT: control target
= control target key end

     0   :  { %vm34_vm0 = vcmask 1044480   ;;  %v255_v1 = vmov 0.0   ;;  %vm256_vm1 = vmmov 0   ;;  %vm30_vm2 = vcmask 105472   ;;  %s310_s0 = inlined_call_operand.vmem [shape: f32[13,8], index: 0, kind: input, shape index: {}]   ;;  %s311_s1 = inlined_call_operand.vmem [shape: f32[8,13], index: 1, kind: input, shape index: {}]   ;;  %s312_s2 = inlined_call_operand.vmem [shape: f32[8,1], index: 2, kind: input, shape index: {}]   ;;  %s313_s3 = inlined_call_operand.vmem [shape: f32[8,8], index: 3, kind: input, shape index: {}]   ;;  %s314_s4 = inlined_call_operand.vmem [shape: f32[8,1], index: 4, kind: input, shape index: {}]   ;;  %s315_s5 = inlined_call_operand.hbm [shape: f32[8,8], index: 5, kind: output, shape index: {}]  }
   0x1   :  { %v22_v0 = vld [vmem:[%s310_s0 + $0x8] sm:$0x1f]  ;;  %214 = vmatprep.subr.mxu0 %v255_v1  ;;  %v21_v2 = vld [vmem:[%s310_s0] sm:$0xff]  ;;  %218 = vmatprep.mubr.msk.f32.mxu0 %vm256_vm1, %v255_v1  ;;  %v257_v5 = vmov 0  }
   0x2   :  { %v24_v3 = vld [vmem:[%s312_s2] sm:$0xff]  ;;  %215 = vmatpush3.msk.msra.mxu0 %vm34_vm0, %v22_v0  ;;  %230 = vset.pattern.permute.xlu0 %v257_v5 }
   0x3   :  { %v23_v4 = vld [vmem:[%s311_s1] sm:$0xff] }
   0x4   :  { %10 = vsyncpa [#allocation3], 0  ;;  %216 = vmatprep.subr.mxu0 %v255_v1  ;;  %27 = vperm.xlu0 %230, %v24_v3   ;;  %v110_v6 = vld [vmem:[%s314_s4] sm:$0xff]  ;;  %vm116_vm3 = vcmask 64512   ;;  %s258_s4 = smov [#allocation2]  }
   0x5   :  { %217 = vmatpush3.msra.mxu0 %v21_v2  ;;  %221 = vmatprep.subr.mxu1 %v255_v1  ;;  %v109_v12 = vld [vmem:[%s313_s3] sm:$0xff]  ;;  %s198_s27 = sshll.u32 %s258_s4, 4  ;;  %s199_s27 = int_to_ptr.vmem [resolvable:$true] %s198_s27 }
   0x6   :  { %219 = vmatmul.mubr.msk.f32.vlgmr.msra.gmra.mxu0 %vm30_vm2, %v23_v4  ;;  %223 = vmatprep.mubr.msk.f32.mxu1 %vm256_vm1, %v255_v1  ;;  %s233_s28 = scalar_lea.vmem %s199_s27, 128  ;;  %p238_p1 = scmp.lt.s32.totalorder %s199_s27, %s199_s27 }
   0x7   :  { %p234_p0 = scmp.ne.s32.totalorder %s199_s27, %s233_s28  ;;  %p239_p2 = scmp.lt.s32.totalorder %s233_s28, %s233_s28 }
   0x8   :  { %113 = vperm.xlu0 %230, %v110_v6  }
   0x9   :  { %p240_p3 = por %p239_p2, %p238_p1 }
   0xb   :  { %p241_p4 = pnand %p240_p3, %p234_p0 }
  0x7f   :  { %v28_v7 = vpop.permute.xlu0 %27 }
  0x83   :  { %v114_v13 = vpop.permute.xlu0 %113 }
  0xc6   :  { %v104_v8 = vpop.f32.mrf.mxu0 }
  0xc7   :  { %v105_v9 = vadd.f32 %v104_v8, %v28_v7 }
  0xc8   :  { %v220_v10 = vpop.f32.mrf.mxu0 }
  0xc9   :  { %v108_v11 = vmax.f32 %v105_v9, 0.0 }
  0xcb   :  { %222 = vmatpush3.msra.mxu1 %v108_v11 }
  0xcc   :  { %224 = vmatmul.mubr.msk.f32.vlgmr.msra.gmra.mxu1 %vm116_vm3, %v109_v12 }
 0x18c   :  { %v186_v14 = vpop.f32.mrf.mxu1 }
 0x18d   :  { %v187_v15 = vadd.f32 %v186_v14, %v114_v13 }
 0x18e   :  { %v225_v16 = vpop.f32.mrf.mxu1 }
 0x18f   :  { %231 = vtanh.f32 %v187_v15 }
 0x19c   :  { %v232_v17 = vpop.eup %231 }
 0x19d   :  { %191 = vst.msk [vmem:[#allocation2] sm:$0xff] %vm116_vm3, %v232_v17 }
 0x19e   :  { %244 = shalt.err (!%p241_p4)
}
 0x19f   :  { %201 = dma.vmem_to_hbm [thread:$0]  %s199_s27, 128, %s315_s5, [#allocation3]  }
 0x1a0   :  { %253 = dma.done.wait [#allocation3], 128  }
 0x1a1   :  { %254 = vsyncadd [#allocation3], 4294967168 }
 0x1a2   :  { %205 = vsyncpa [#allocation3], 1 }

</bundles_post_ra>
